<compile_context>
chip_gen: v5e
topology: v5e:2x2
jax: 0.10.0
libtpu: 0.0.40
codegen_flags: <defaults>
</compile_context>

<pallas_src>
import functools

import jax
import jax.numpy as jnp
from jax.experimental import pallas as pl
from jax.experimental.pallas import tpu as pltpu

_HIDDEN = 256
_TILE = 256                      # tile for the dense N x N aggregation
_VMEM_LIMIT = 32 * 1024 * 1024   # safe on v5e/v6e/v7x


def _round_up(v, m):
    return ((v + m - 1) // m) * m


# ---------------------------------------------------------------------------
# Fused GCN layer kernel:
#   out = [relu]( (A_hat @ H) @ W + b ) [+ residual]
# grid = (row tiles, K reduction).  A_hat @ H accumulates in an f32 VMEM
# scratch; the resident weight multiply + bias + ReLU + residual run only on
# the final reduction step (pl.when), so each layer touches HBM once.
# ---------------------------------------------------------------------------
def _gcn_layer_kernel(*refs, relu, has_residual):
    a_ref, h_ref, w_ref, b_ref = refs[:4]
    idx = 4
    res_ref = None
    if has_residual:
        res_ref = refs[idx]
        idx += 1
    out_ref, acc_ref = refs[idx], refs[idx + 1]

    k = pl.program_id(1)

    @pl.when(k == 0)
    def _():
        acc_ref[...] = jnp.zeros_like(acc_ref)

    acc_ref[...] += jnp.dot(a_ref[...], h_ref[...],
                            preferred_element_type=jnp.float32)

    @pl.when(k == pl.num_programs(1) - 1)
    def _():
        agg = acc_ref[...].astype(jnp.bfloat16)
        r = jnp.dot(agg, w_ref[...], preferred_element_type=jnp.float32)
        r = r + b_ref[...]
        if relu:
            r = jnp.maximum(r, 0.0)
        if has_residual:
            r = r + res_ref[...].astype(jnp.float32)
        out_ref[...] = r.astype(out_ref.dtype)


def gcn_layer(a_hat, h, w, b, residual=None, *, relu=True,
              out_dtype=jnp.bfloat16, tm=_TILE, tk=_TILE):
    M, K = a_hat.shape
    Kh, Fin = h.shape
    assert K == Kh
    Fout = w.shape[1]
    tm, tk = min(tm, M), min(tk, K)
    assert M % tm == 0 and K % tk == 0, (M, K, tm, tk)
    grid = (M // tm, K // tk)

    in_specs = [
        pl.BlockSpec((tm, tk), lambda i, k: (i, k)),       # A_hat tile
        pl.BlockSpec((tk, Fin), lambda i, k: (k, 0)),      # H tile
        pl.BlockSpec((Fin, Fout), lambda i, k: (0, 0)),    # W (resident)
        pl.BlockSpec((1, Fout), lambda i, k: (0, 0)),      # bias (resident)
    ]
    args = [a_hat, h, w, b]
    if residual is not None:
        in_specs.append(pl.BlockSpec((tm, Fout), lambda i, k: (i, 0)))
        args.append(residual)

    kernel = functools.partial(_gcn_layer_kernel, relu=relu,
                               has_residual=residual is not None)
    flops = 2 * M * K * Fin + 2 * M * Fin * Fout
    bytes_accessed = int(a_hat.size * a_hat.dtype.itemsize
                         + h.size * h.dtype.itemsize
                         + w.size * w.dtype.itemsize
                         + M * Fout * jnp.dtype(out_dtype).itemsize)
    return pl.pallas_call(
        kernel,
        out_shape=jax.ShapeDtypeStruct((M, Fout), out_dtype),
        grid_spec=pltpu.PrefetchScalarGridSpec(
            num_scalar_prefetch=0,
            grid=grid,
            in_specs=in_specs,
            out_specs=pl.BlockSpec((tm, Fout), lambda i, k: (i, 0)),
            scratch_shapes=[pltpu.VMEM((tm, Fin), jnp.float32)]),
        compiler_params=pltpu.CompilerParams(
            dimension_semantics=("parallel", "arbitrary"),
            vmem_limit_bytes=_VMEM_LIMIT),
        cost_estimate=pl.CostEstimate(flops=flops, transcendentals=0,
                                      bytes_accessed=bytes_accessed),
    )(*args)


# ---------------------------------------------------------------------------
# Epilogue kernel: graph sum-pool (accumulated over node tiles) -> mean scale
# -> projection MLP -> masked LayerNorm, run only on the last reduction step.
# ---------------------------------------------------------------------------
def _epilogue_kernel(pool_ref, h3_ref, invc_ref, wp1_ref, bp1_ref,
                     wp2_ref, bp2_ref, gamma_ref, beta_ref,
                     out_ref, g_acc, *, e_real):
    k = pl.program_id(0)

    @pl.when(k == 0)
    def _():
        g_acc[...] = jnp.zeros_like(g_acc)

    g_acc[...] += jnp.dot(pool_ref[...], h3_ref[...],
                          preferred_element_type=jnp.float32)

    @pl.when(k == pl.num_programs(0) - 1)
    def _():
        # mean pool = (sum pool) * 1/|V_b|, scaled in f32.
        g = (g_acc[...] * invc_ref[...]).astype(jnp.bfloat16)
        # Linear -> ReLU -> Dropout (inference identity) -> Linear
        # TODO(synk): training-mode dropout would need pltpu.prng_* masking.
        p = jnp.dot(g, wp1_ref[...], preferred_element_type=jnp.float32)
        p = jnp.maximum(p + bp1_ref[...], 0.0)
        e = jnp.dot(p.astype(jnp.bfloat16), wp2_ref[...],
                    preferred_element_type=jnp.float32) + bp2_ref[...]
        # LayerNorm over the real (unpadded) embedding lanes only.
        lane = jax.lax.broadcasted_iota(jnp.int32, e.shape, 1)
        mask = (lane < e_real).astype(jnp.float32)
        inv_e = 1.0 / float(e_real)
        mu = jnp.sum(e * mask, axis=-1, keepdims=True) * inv_e
        d = (e - mu) * mask
        var = jnp.sum(d * d, axis=-1, keepdims=True) * inv_e
        y = d * jax.lax.rsqrt(var + 1e-5)
        out_ref[...] = y * gamma_ref[...] + beta_ref[...]


def epilogue(pool, h3, inv_counts, wp1, bp1, wp2p, bp2p, gammap, betap,
             e_real, *, tk=_TILE):
    B, Np = pool.shape
    H = h3.shape[1]
    Ep = wp2p.shape[1]
    tk = min(tk, Np)
    assert Np % tk == 0
    grid = (Np // tk,)
    kernel = functools.partial(_epilogue_kernel, e_real=e_real)
    return pl.pallas_call(
        kernel,
        out_shape=jax.ShapeDtypeStruct((B, Ep), jnp.float32),
        grid_spec=pltpu.PrefetchScalarGridSpec(
            num_scalar_prefetch=0,
            grid=grid,
            in_specs=[
                pl.BlockSpec((B, tk), lambda k: (0, k)),     # pool indicator
                pl.BlockSpec((tk, H), lambda k: (k, 0)),     # h3 tile
                pl.BlockSpec((B, H), lambda k: (0, 0)),      # 1/|V_b| (bcast)
                pl.BlockSpec((H, H), lambda k: (0, 0)),      # wp1 (resident)
                pl.BlockSpec((1, H), lambda k: (0, 0)),      # bp1
                pl.BlockSpec((H, Ep), lambda k: (0, 0)),     # wp2 (padded)
                pl.BlockSpec((1, Ep), lambda k: (0, 0)),     # bp2 (padded)
                pl.BlockSpec((1, Ep), lambda k: (0, 0)),     # gamma (padded)
                pl.BlockSpec((1, Ep), lambda k: (0, 0)),     # beta (padded)
            ],
            out_specs=pl.BlockSpec((B, Ep), lambda k: (0, 0)),
            scratch_shapes=[pltpu.VMEM((B, H), jnp.float32)]),
        compiler_params=pltpu.CompilerParams(
            dimension_semantics=("arbitrary",),
            vmem_limit_bytes=_VMEM_LIMIT),
    )(pool, h3, inv_counts, wp1, bp1, wp2p, bp2p, gammap, betap)


# ---------------------------------------------------------------------------
# Forward pass: plain-JAX glue (dense A_hat / pool construction + padding)
# followed by the Pallas kernels.
# ---------------------------------------------------------------------------
def graph_encoder_forward(x, edge_index, batch, params, num_graphs):
    N, F = x.shape
    E = params["gamma"].shape[-1]
    H = params["w2"].shape[0]

    Np = _round_up(max(N, _TILE), _TILE)
    Fp = _round_up(max(F, 128), 128)
    Ep = _round_up(max(E, 128), 128)

    # Dense adjacency with self loops, symmetric norm D^-1/2 (A+I) D^-1/2.
    src, dst = edge_index[0], edge_index[1]
    A = jnp.zeros((N, N), jnp.float32).at[dst, src].max(1.0)
    A = A + jnp.eye(N, dtype=jnp.float32)
    deg = jnp.sum(A, axis=1)
    dinv = jax.lax.rsqrt(jnp.maximum(deg, 1e-12))
    A_hat = A * dinv[:, None] * dinv[None, :]
    A_hat = jnp.zeros((Np, Np), jnp.float32).at[:N, :N].set(A_hat)
    A_hat = A_hat.astype(jnp.bfloat16)

    Xp = jnp.zeros((Np, Fp), jnp.float32).at[:N, :F].set(x).astype(jnp.bfloat16)

    # Graph membership indicator (exact 0/1 in bf16) + per-graph 1/|V_b|.
    one_hot = (batch[None, :] == jnp.arange(num_graphs)[:, None]).astype(jnp.float32)
    counts = jnp.maximum(jnp.sum(one_hot, axis=1, keepdims=True), 1.0)
    pool = jnp.zeros((num_graphs, Np), jnp.float32).at[:, :N].set(one_hot)
    pool = pool.astype(jnp.bfloat16)
    inv_counts = jnp.broadcast_to(1.0 / counts, (num_graphs, H)).astype(jnp.float32)

    bf = lambda t: t.astype(jnp.bfloat16)
    w1p = bf(jnp.zeros((Fp, H), jnp.float32).at[:F, :].set(params["w1"]))
    w2, w3, wp1 = bf(params["w2"]), bf(params["w3"]), bf(params["wp1"])
    wp2p = bf(jnp.zeros((H, Ep), jnp.float32).at[:, :E].set(params["wp2"]))
    bp2p = jnp.zeros((1, Ep), jnp.float32).at[:, :E].set(params["bp2"])
    gammap = jnp.zeros((1, Ep), jnp.float32).at[:, :E].set(params["gamma"])
    betap = jnp.zeros((1, Ep), jnp.float32).at[:, :E].set(params["beta"])

    # Three fused GCN layers: out = relu((A_hat @ H) @ W + b) [+ residual].
    h1 = gcn_layer(A_hat, Xp, w1p, params["b1"])                       # [Np, 256]
    h2 = gcn_layer(A_hat, h1, w2, params["b2"], residual=h1)           # [Np, 256]
    h3 = gcn_layer(A_hat, h2, w3, params["b3"], residual=h2)           # [Np, 256]

    # Mean pool + projection MLP + LayerNorm (lane-dense padded output).
    out_p = epilogue(pool, h3, inv_counts, wp1, params["bp1"], wp2p, bp2p,
                     gammap, betap, E)
    return out_p[:, :E]


def init_params(key, node_feature_dim, embedding_dim, hidden=_HIDDEN):
    ks = jax.random.split(key, 10)

    def lin(k, fan_in, fan_out):
        scale = 1.0 / jnp.sqrt(fan_in)
        return jax.random.uniform(k, (fan_in, fan_out), jnp.float32, -scale, scale)

    return {
        "w1": lin(ks[0], node_feature_dim, hidden),
        "b1": jnp.zeros((1, hidden), jnp.float32),
        "w2": lin(ks[1], hidden, hidden),
        "b2": jnp.zeros((1, hidden), jnp.float32),
        "w3": lin(ks[2], hidden, hidden),
        "b3": jnp.zeros((1, hidden), jnp.float32),
        "wp1": lin(ks[3], hidden, hidden),
        "bp1": jax.random.uniform(ks[4], (1, hidden), jnp.float32, -0.05, 0.05),
        "wp2": lin(ks[5], hidden, embedding_dim),
        "bp2": jax.random.uniform(ks[6], (1, embedding_dim), jnp.float32, -0.05, 0.05),
        "gamma": jnp.ones((1, embedding_dim), jnp.float32),
        "beta": jnp.zeros((1, embedding_dim), jnp.float32),
    }


if __name__ == "__main__":
    key = jax.random.PRNGKey(0)
    node_feature_dim = 16
    embedding_dim = 32
    num_graphs = 2
    nodes_per_graph = 8
    N = num_graphs * nodes_per_graph

    k_x, k_p = jax.random.split(key)
    x = jax.random.normal(k_x, (N, node_feature_dim), jnp.float32)

    # Two disjoint ring graphs (undirected edges stored in both directions).
    src_list, dst_list = [], []
    for g in range(num_graphs):
        base = g * nodes_per_graph
        for i in range(nodes_per_graph):
            a = base + i
            b = base + (i + 1) % nodes_per_graph
            src_list += [a, b]
            dst_list += [b, a]
    edge_index = jnp.array([src_list, dst_list], dtype=jnp.int32)
    batch = jnp.repeat(jnp.arange(num_graphs, dtype=jnp.int32), nodes_per_graph)

    params = init_params(k_p, node_feature_dim, embedding_dim)

    out = graph_encoder_forward(x, edge_index, batch, params, num_graphs)
    jax.block_until_ready(out)
    assert out.shape == (num_graphs, embedding_dim)
    assert bool(jnp.all(jnp.isfinite(out)))
    print("KERNEL_OK")
</pallas_src>

<mosaic_0001>
module attributes {stable_mosaic.version = 11 : i64} {
  func.func @_gcn_layer_kernel(%arg0: i32, %arg1: i32, %arg2: memref<256x256xbf16, #tpu.memory_space<vmem>>, %arg3: memref<256x128xbf16, #tpu.memory_space<vmem>>, %arg4: memref<128x256xbf16, #tpu.memory_space<vmem>>, %arg5: memref<1x256xf32, #tpu.memory_space<vmem>>, %arg6: memref<256x256xbf16, #tpu.memory_space<vmem>>, %arg7: memref<256x128xf32, #tpu.memory_space<vmem>>) attributes {dimension_semantics = [#tpu.dimension_semantics<parallel>, #tpu.dimension_semantics<arbitrary>], iteration_bounds = array<i64: 1, 1>, scalar_prefetch = 0 : i64, scratch_operands = 1 : i64, tpu.core_type = #tpu.core_type<tc>, window_params = [{transform_indices = @transform_0, window_bounds = array<i64: 256, 256>}, {transform_indices = @transform_1, window_bounds = array<i64: 256, 128>}, {pipeline_mode = #tpu.pipeline_mode<synchronous>, transform_indices = @transform_2, window_bounds = array<i64: 128, 256>}, {pipeline_mode = #tpu.pipeline_mode<synchronous>, transform_indices = @transform_3, window_bounds = array<i64: 1, 256>}, {transform_indices = @transform_4, window_bounds = array<i64: 256, 256>}]} {
    %c0_i32 = arith.constant 0 : i32
    %0 = arith.cmpi eq, %arg1, %c0_i32 : i32
    %1 = arith.extui %0 : i1 to i32
    %c0_i32_0 = arith.constant 0 : i32
    %2 = arith.cmpi ne, %1, %c0_i32_0 : i32
    scf.if %2 {
      %cst_10 = arith.constant 0.000000e+00 : f32
      %12 = vector.broadcast %cst_10 : f32 to vector<256x128xf32>
      %c0_11 = arith.constant 0 : index
      %c0_12 = arith.constant 0 : index
      %13 = vector.load %arg7[%c0_11, %c0_12] : memref<256x128xf32, #tpu.memory_space<vmem>>, vector<256x128xf32>
      tpu.vector_store %arg7[%c0_11, %c0_12], %12 {strides = array<i32>} : memref<256x128xf32, #tpu.memory_space<vmem>>, vector<256x128xf32>,
    } else {
    }
    %c0 = arith.constant 0 : index
    %c0_1 = arith.constant 0 : index
    %3 = vector.load %arg7[%c0, %c0_1] : memref<256x128xf32, #tpu.memory_space<vmem>>, vector<256x128xf32>
    %c0_2 = arith.constant 0 : index
    %c0_3 = arith.constant 0 : index
    %4 = vector.load %arg2[%c0_2, %c0_3] : memref<256x256xbf16, #tpu.memory_space<vmem>>, vector<256x256xbf16>
    %c0_4 = arith.constant 0 : index
    %c0_5 = arith.constant 0 : index
    %5 = vector.load %arg3[%c0_4, %c0_5] : memref<256x128xbf16, #tpu.memory_space<vmem>>, vector<256x128xbf16>
    %cst = arith.constant dense<0.000000e+00> : vector<256x128xf32>
    %6 = tpu.matmul %4, %5, %cst {dimension_numbers = #tpu.dot_dimension_numbers<[1], [0], [0], [1], [0, 0, 1, 1], [], []>} : vector<256x256xbf16>, vector<256x128xbf16>, vector<256x128xf32> -> vector<256x128xf32>
    %7 = arith.addf %3, %6 : vector<256x128xf32>
    %c0_6 = arith.constant 0 : index
    %c0_7 = arith.constant 0 : index
    %8 = vector.load %arg7[%c0_6, %c0_7] : memref<256x128xf32, #tpu.memory_space<vmem>>, vector<256x128xf32>
    tpu.vector_store %arg7[%c0_6, %c0_7], %7 {strides = array<i32>} : memref<256x128xf32, #tpu.memory_space<vmem>>, vector<256x128xf32>,
    %c0_i32_8 = arith.constant 0 : i32
    %9 = arith.cmpi eq, %arg1, %c0_i32_8 : i32
    %10 = arith.extui %9 : i1 to i32
    %c0_i32_9 = arith.constant 0 : i32
    %11 = arith.cmpi ne, %10, %c0_i32_9 : i32
    scf.if %11 {
      %c0_10 = arith.constant 0 : index
      %c0_11 = arith.constant 0 : index
      %12 = vector.load %arg7[%c0_10, %c0_11] : memref<256x128xf32, #tpu.memory_space<vmem>>, vector<256x128xf32>
      %13 = arith.truncf %12 : vector<256x128xf32> to vector<256x128xbf16>
      %c0_12 = arith.constant 0 : index
      %c0_13 = arith.constant 0 : index
      %14 = vector.load %arg4[%c0_12, %c0_13] : memref<128x256xbf16, #tpu.memory_space<vmem>>, vector<128x256xbf16>
      %cst_14 = arith.constant dense<0.000000e+00> : vector<256x256xf32>
      %15 = tpu.matmul %13, %14, %cst_14 {dimension_numbers = #tpu.dot_dimension_numbers<[1], [0], [0], [1], [0, 0, 1, 1], [], []>} : vector<256x128xbf16>, vector<128x256xbf16>, vector<256x256xf32> -> vector<256x256xf32>
      %c0_15 = arith.constant 0 : index
      %c0_16 = arith.constant 0 : index
      %16 = vector.load %arg5[%c0_15, %c0_16] : memref<1x256xf32, #tpu.memory_space<vmem>>, vector<1x256xf32>
      %17 = vector.broadcast %16 : vector<1x256xf32> to vector<256x256xf32>
      %18 = arith.addf %15, %17 : vector<256x256xf32>
      %cst_17 = arith.constant 0.000000e+00 : f32
      %19 = vector.broadcast %cst_17 : f32 to vector<256x256xf32>
      %20 = arith.maximumf %18, %19 : vector<256x256xf32>
      %21 = arith.truncf %20 : vector<256x256xf32> to vector<256x256xbf16>
      %c0_18 = arith.constant 0 : index
      %c0_19 = arith.constant 0 : index
      %22 = vector.load %arg6[%c0_18, %c0_19] : memref<256x256xbf16, #tpu.memory_space<vmem>>, vector<256x256xbf16>
      tpu.vector_store %arg6[%c0_18, %c0_19], %21 {strides = array<i32>} : memref<256x256xbf16, #tpu.memory_space<vmem>>, vector<256x256xbf16>,
    } else {
    }
    return
  }
  func.func @transform_0(%arg0: i32, %arg1: i32) -> (i32, i32) {
    %c0_i32 = arith.constant 0 : i32
    return %arg0, %arg1 : i32, i32
  }
  func.func @transform_1(%arg0: i32, %arg1: i32) -> (i32, i32) {
    %c0_i32 = arith.constant 0 : i32
    %c0_i32_0 = arith.constant 0 : i32
    return %arg1, %c0_i32 : i32, i32
  }
  func.func @transform_2(%arg0: i32, %arg1: i32) -> (i32, i32) {
    %c0_i32 = arith.constant 0 : i32
    %c0_i32_0 = arith.constant 0 : i32
    %c0_i32_1 = arith.constant 0 : i32
    return %c0_i32, %c0_i32_0 : i32, i32
  }
  func.func @transform_3(%arg0: i32, %arg1: i32) -> (i32, i32) {
    %c0_i32 = arith.constant 0 : i32
    %c0_i32_0 = arith.constant 0 : i32
    %c0_i32_1 = arith.constant 0 : i32
    return %c0_i32, %c0_i32_0 : i32, i32
  }
  func.func @transform_4(%arg0: i32, %arg1: i32) -> (i32, i32) {
    %c0_i32 = arith.constant 0 : i32
    %c0_i32_0 = arith.constant 0 : i32
    return %arg0, %c0_i32 : i32, i32
  }
}

</mosaic_0001>

<bundles_post_ra>
// kernel: tpu_custom_call.1
= control target key start
LH: loop header
LB: loop body
LE: loop exit
PB: predicated region body
PF: predicated region fallthrough
CT: control target
= control target key end

     0   :  { %9 = vsyncpa [#allocation4], 0  ;;  %s1729_s0 = inlined_call_operand.hbm [shape: bf16[256,256], index: 0, kind: input, shape index: {}]   ;;  %s1730_s1 = inlined_call_operand.hbm [shape: bf16[256,128], index: 1, kind: input, shape index: {}]   ;;  %s1731_s2 = inlined_call_operand.hbm [shape: bf16[128,256], index: 2, kind: input, shape index: {}]   ;;  %s1732_s3 = inlined_call_operand.vmem [shape: f32[1,256], index: 3, kind: input, shape index: {}]   ;;  %s1733_s4 = inlined_call_operand.hbm [shape: bf16[256,256], index: 4, kind: output, shape index: {}]  }
   0x1   :  { %10 = vsyncpa [#allocation7], 0  ;;  %s29_s17 = sshll.u32 %s1730_s1, 4  ;;  %s30_s17 = int_to_ptr.hbm [resolvable:$true] %s29_s17 }
   0x2   :  { %11 = vsyncpa [#allocation5], 0  ;;  %s1604_s18 = smov [#allocation6]   ;;  %s16_s22 = sshll.u32 %s1729_s0, 4  ;;  %s17_s22 = int_to_ptr.hbm [resolvable:$true] %s16_s22 }
   0x3   :  { %s31_s19 = sshll.u32 %s1604_s18, 4  ;;  %s1605_s23 = smov 64   ;;  %s32_s19 = int_to_ptr.vmem [resolvable:$true] %s31_s19 }
   0x4   :  { %s1606_s24 = smov 4   ;;  %s1607_s25 = smov [#allocation3]  }
   0x5   :  { %37 = dma.hbm_to_vmem [thread:$0]  %s30_s17, 2048, %s32_s19, [#allocation7], %s1605_s23, %s1605_s23, %s1606_s24  }
   0x6   :  { %s18_s26 = sshll.u32 %s1607_s25, 4  ;;  %s1608_s27 = smov 128   ;;  %s19_s26 = int_to_ptr.vmem [resolvable:$true] %s18_s26 }
   0x7   :  { %s1609_s28 = smov 8   ;;  %s42_s30 = sshll.u32 %s1731_s2, 4  ;;  %s43_s30 = int_to_ptr.hbm [resolvable:$true] %s42_s30 }
   0x8   :  { %24 = dma.hbm_to_vmem [thread:$0]  %s17_s22, 4096, %s19_s26, [#allocation4], %s1608_s27, %s1608_s27, %s1609_s28  }
   0x9   :  { %s1610_s5 = smov [#allocation8]  }
   0xa   :  { %s44_s0 = sshll.u32 %s1610_s5, 4  ;;  %s45_s0 = int_to_ptr.vmem [resolvable:$true] %s44_s0 }
   0xb   :  { %50 = dma.hbm_to_vmem [thread:$0]  %s43_s30, 2048, %s45_s0, [#allocation7], %s1608_s27, %s1608_s27, %s1609_s28  }
   0xc   :  { %1598 = dma.done.wait [#allocation4], 4096  }
   0xd   :  { %1599 = vsyncadd [#allocation4], 4294963200 }
   0xe   :  { %1600 = dma.done.wait [#allocation7], 4096  }
   0xf   :  { %1601 = vsyncadd [#allocation7], 4294963200  ;;  %v1469_v0 = vld [vmem:[#allocation6 + $0x38] sm:$0xff]  ;;  %v1468_v2 = vld [vmem:[#allocation6 + $0x30] sm:$0xff]  ;;  %s1160_s10 = sshll.u32 %s1733_s4, 4  ;;  %s1161_s10 = int_to_ptr.hbm [resolvable:$true] %s1160_s10 }
  0x10   :  { %v1477_v1 = vld [vmem:[#allocation6 + $0x78] sm:$0xff]  ;;  %453 = vmatpush.bf16.msra.mxu0 %v1469_v0  ;;  %v1476_v3 = vld [vmem:[#allocation6 + $0x70] sm:$0xff]  ;;  %v1467_v4 = vld [vmem:[#allocation6 + $0x28] sm:$0xff] }
  0x11   :  { %542 = vmatpush.bf16.msra.mxu1 %v1477_v1  ;;  %v1475_v5 = vld [vmem:[#allocation6 + $0x68] sm:$0xff]  ;;  %v1466_v6 = vld [vmem:[#allocation6 + $0x20] sm:$0xff]  ;;  %v1465_v8 = vld [vmem:[#allocation6 + $0x18] sm:$0xff] }
  0x12   :  { %v1474_v7 = vld [vmem:[#allocation6 + $0x60] sm:$0xff]  ;;  %v1473_v9 = vld [vmem:[#allocation6 + $0x58] sm:$0xff]  ;;  %v1464_v10 = vld [vmem:[#allocation6 + $0x10] sm:$0xff] }
  0x13   :  { %v1472_v11 = vld [vmem:[#allocation6 + $0x50] sm:$0xff]  ;;  %v1463_v12 = vld [vmem:[#allocation6 + $0x8] sm:$0xff]  ;;  %v1462_v14 = vld [vmem:[#allocation6] sm:$0xff] }
  0x14   :  { %454 = vmatpush.bf16.msra.mxu0 %v1468_v2  ;;  %v1471_v13 = vld [vmem:[#allocation6 + $0x48] sm:$0xff]  ;;  %v1470_v15 = vld [vmem:[#allocation6 + $0x40] sm:$0xff]  ;;  %v1184_v22 = vld [vmem:[#allocation3 + $0x10] sm:$0xf] }
  0x15   :  { %543 = vmatpush.bf16.msra.mxu1 %v1476_v3  ;;  %v1176_v16 = vld [vmem:[#allocation3] sm:$0xf]  ;;  %v1431_v17 = vld [vmem:[#allocation3 + $0x4] sm:$0xf0]  ;;  %v1430_v18 = vld [vmem:[#allocation3 + $0x4] sm:$0xf] }
  0x16   :  { %v1178_v19 = vld [vmem:[#allocation3 + $0x8] sm:$0xf0]  ;;  %v1177_v20 = vor.u32 %v1431_v17, %v1176_v16  ;;  %v1433_v23 = vld [vmem:[#allocation3 + $0x14] sm:$0xf0]  ;;  %v1432_v24 = vld [vmem:[#allocation3 + $0x14] sm:$0xf] }
  0x17   :  { %v1181_v21 = vor.u32 %v1430_v18, %v1178_v19  ;;  %v1186_v25 = vld [vmem:[#allocation3 + $0x18] sm:$0xf0]  ;;  %v1185_v26 = vor.u32 %v1433_v23, %v1184_v22  ;;  %v1192_v28 = vld [vmem:[#allocation3 + $0x20] sm:$0xf]  ;;  %v1435_v29 = vld [vmem:[#allocation3 + $0x24] sm:$0xf0] }
  0x18   :  { %455 = vmatpush.bf16.msra.mxu0 %v1467_v4  ;;  %v1189_v27 = vor.u32 %v1432_v24, %v1186_v25  ;;  %v1434_v30 = vld [vmem:[#allocation3 + $0x24] sm:$0xf]  ;;  %v1194_v31 = vld [vmem:[#allocation3 + $0x28] sm:$0xf0]  ;;  %v1193_v32 = vor.u32 %v1435_v29, %v1192_v28  ;;  %v1200_v34 = vld [vmem:[#allocation3 + $0x30] sm:$0xf] }
  0x19   :  { %544 = vmatpush.bf16.msra.mxu1 %v1475_v5  ;;  %v1197_v33 = vor.u32 %v1434_v30, %v1194_v31  ;;  %v1437_v35 = vld [vmem:[#allocation3 + $0x34] sm:$0xf0]  ;;  %v1436_v36 = vld [vmem:[#allocation3 + $0x34] sm:$0xf]  ;;  %v1202_v37 = vld [vmem:[#allocation3 + $0x38] sm:$0xf0] }
  0x1a   :  { %v1201_v38 = vor.u32 %v1437_v35, %v1200_v34  ;;  %v1205_v39 = vor.u32 %v1436_v36, %v1202_v37  ;;  %v1208_v40 = vld [vmem:[#allocation3 + $0x40] sm:$0xf]  ;;  %v1439_v41 = vld [vmem:[#allocation3 + $0x44] sm:$0xf0]  ;;  %v1438_v42 = vld [vmem:[#allocation3 + $0x44] sm:$0xf] }
  0x1b   :  { %v1210_v43 = vld [vmem:[#allocation3 + $0x48] sm:$0xf0]  ;;  %v1209_v44 = vor.u32 %v1439_v41, %v1208_v40  ;;  %v1424_v46 = vld [vmem:[#allocation8 + $0x70] sm:$0xf]  ;;  %v1493_v47 = vld [vmem:[#allocation8 + $0x74] sm:$0xf0] }
  0x1c   :  { %456 = vmatpush.bf16.msra.mxu0 %v1466_v6  ;;  %v1213_v45 = vor.u32 %v1438_v42, %v1210_v43  ;;  %v1492_v48 = vld [vmem:[#allocation8 + $0x74] sm:$0xf]  ;;  %v1425_v49 = vor.u32 %v1493_v47, %v1424_v46  ;;  %v1426_v50 = vld [vmem:[#allocation8 + $0x78] sm:$0xf0]  ;;  %v1416_v51 = vld [vmem:[#allocation8 + $0x60] sm:$0xf] }
  0x1d   :  { %545 = vmatpush.bf16.msra.mxu1 %v1474_v7  ;;  %v1491_v52 = vld [vmem:[#allocation8 + $0x64] sm:$0xf0]  ;;  %v1429_v53 = vor.u32 %v1492_v48, %v1426_v50  ;;  %v1490_v54 = vld [vmem:[#allocation8 + $0x64] sm:$0xf]  ;;  %v1418_v55 = vld [vmem:[#allocation8 + $0x68] sm:$0xf0] }
  0x1e   :  { %848 = vmatpush.bf16.msra.mxu2 %v1425_v49  ;;  %v1417_v56 = vor.u32 %v1491_v52, %v1416_v51  ;;  %v1421_v57 = vor.u32 %v1490_v54, %v1418_v55  ;;  %v1216_v58 = vld [vmem:[#allocation3 + $0x50] sm:$0xf]  ;;  %v1441_v59 = vld [vmem:[#allocation3 + $0x54] sm:$0xf0]  ;;  %v1440_v60 = vld [vmem:[#allocation3 + $0x54] sm:$0xf] }
  0x1f   :  { %937 = vmatpush.bf16.msra.mxu3 %v1429_v53  ;;  %v1218_v61 = vld [vmem:[#allocation3 + $0x58] sm:$0xf0]  ;;  %v1217_v62 = vor.u32 %v1441_v59, %v1216_v58  ;;  %v1408_v0 = vld [vmem:[#allocation8 + $0x50] sm:$0xf]  ;;  %v1489_v1 = vld [vmem:[#allocation8 + $0x54] sm:$0xf0] }
  0x20   :  { %457 = vmatpush.bf16.msra.mxu0 %v1465_v8  ;;  %v1221_v63 = vor.u32 %v1440_v60, %v1218_v61  ;;  %v1488_v2 = vld [vmem:[#allocation8 + $0x54] sm:$0xf]  ;;  %v1409_v3 = vor.u32 %v1489_v1, %v1408_v0  ;;  %v1410_v4 = vld [vmem:[#allocation8 + $0x58] sm:$0xf0]  ;;  %v1400_v5 = vld [vmem:[#allocation8 + $0x40] sm:$0xf] }
  0x21   :  { %546 = vmatpush.bf16.msra.mxu1 %v1473_v9  ;;  %v1487_v6 = vld [vmem:[#allocation8 + $0x44] sm:$0xf0]  ;;  %v1413_v7 = vor.u32 %v1488_v2, %v1410_v4  ;;  %v1486_v8 = vld [vmem:[#allocation8 + $0x44] sm:$0xf]  ;;  %v1402_v9 = vld [vmem:[#allocation8 + $0x48] sm:$0xf0] }
  0x22   :  { %849 = vmatpush.bf16.msra.mxu2 %v1417_v56  ;;  %v1224_v17 = vld [vmem:[#allocation3 + $0x60] sm:$0xf]  ;;  %v1443_v19 = vld [vmem:[#allocation3 + $0x64] sm:$0xf0]  ;;  %v1386_v28 = vld [vmem:[#allocation8 + $0x28] sm:$0xf0] }
  0x23   :  { %938 = vmatpush.bf16.msra.mxu3 %v1421_v57  ;;  %v1225_v22 = vor.u32 %v1443_v19, %v1224_v17  ;;  %v1384_v24 = vld [vmem:[#allocation8 + $0x20] sm:$0xf]  ;;  %v1483_v25 = vld [vmem:[#allocation8 + $0x24] sm:$0xf0]  ;;  %v1376_v30 = vld [vmem:[#allocation8 + $0x10] sm:$0xf] }
  0x24   :  { %458 = vmatpush.bf16.msra.mxu0 %v1464_v10  ;;  %v1401_v10 = vor.u32 %v1487_v6, %v1400_v5  ;;  %v1481_v31 = vld [vmem:[#allocation8 + $0x14] sm:$0xf0]  ;;  %v1378_v34 = vld [vmem:[#allocation8 + $0x18] sm:$0xf0]  ;;  %v1368_v36 = vld [vmem:[#allocation8] sm:$0xf] }
  0x25   :  { %547 = vmatpush.bf16.msra.mxu1 %v1472_v11  ;;  %v1405_v11 = vor.u32 %v1486_v8, %v1402_v9  ;;  %v1479_v37 = vld [vmem:[#allocation8 + $0x4] sm:$0xf0]  ;;  %v1370_v40 = vld [vmem:[#allocation8 + $0x8] sm:$0xf0]  ;;  %v1232_v42 = vld [vmem:[#allocation3 + $0x70] sm:$0xf] }
  0x26   :  { %850 = vmatpush.bf16.msra.mxu2 %v1409_v3  ;;  %v1445_v43 = vld [vmem:[#allocation3 + $0x74] sm:$0xf0]  ;;  %v1240_v48 = vld [vmem:[#allocation3 + $0x80] sm:$0xf]  ;;  %v1447_v49 = vld [vmem:[#allocation3 + $0x84] sm:$0xf0] }
  0x27   :  { %939 = vmatpush.bf16.msra.mxu3 %v1413_v7  ;;  %v1233_v46 = vor.u32 %v1445_v43, %v1232_v42  ;;  %v1446_v50 = vld [vmem:[#allocation3 + $0x84] sm:$0xf]  ;;  %v1242_v51 = vld [vmem:[#allocation3 + $0x88] sm:$0xf0]  ;;  %v1241_v52 = vor.u32 %v1447_v49, %v1240_v48  ;;  %v1248_v61 = vld [vmem:[#allocation3 + $0x90] sm:$0xf] }
  0x28   :  { %459 = vmatpush.bf16.msra.mxu0 %v1463_v12  ;;  %v1392_v12 = vld [vmem:[#allocation8 + $0x30] sm:$0xf]  ;;  %v1245_v53 = vor.u32 %v1446_v50, %v1242_v51  ;;  %v1250_v0 = vld [vmem:[#allocation3 + $0x98] sm:$0xf0]  ;;  %v1457_v50 = vld [vmem:[#allocation3 + $0xd4] sm:$0xf0] }
  0x29   :  { %548 = vmatpush.bf16.msra.mxu1 %v1471_v13  ;;  %v1485_v13 = vld [vmem:[#allocation8 + $0x34] sm:$0xf0]  ;;  %v1280_v49 = vld [vmem:[#allocation3 + $0xd0] sm:$0xf]  ;;  %v1456_v51 = vld [vmem:[#allocation3 + $0xd4] sm:$0xf] }
  0x2a   :  { %851 = vmatpush.bf16.msra.mxu2 %v1401_v10  ;;  %v1393_v16 = vor.u32 %v1485_v13, %v1392_v12  ;;  %v1256_v10 = vld [vmem:[#allocation3 + $0xa0] sm:$0xf]  ;;  %v1450_v12 = vld [vmem:[#allocation3 + $0xa4] sm:$0xf]  ;;  %v1258_v13 = vld [vmem:[#allocation3 + $0xa8] sm:$0xf0] }
  0x2b   :  { %940 = vmatpush.bf16.msra.mxu3 %v1405_v11  ;;  %v1451_v11 = vld [vmem:[#allocation3 + $0xa4] sm:$0xf0] }
  0x2c   :  { %460 = vmatpush.bf16.msra.mxu0 %v1462_v14  ;;  %v1484_v14 = vld [vmem:[#allocation8 + $0x34] sm:$0xf] }
  0x2d   :  { %549 = vmatpush.bf16.msra.mxu1 %v1470_v15  ;;  %v1394_v15 = vld [vmem:[#allocation8 + $0x38] sm:$0xf0] }
  0x2e   :  { %v1397_v18 = vor.u32 %v1484_v14, %v1394_v15  ;;  %852 = vmatpush.bf16.msra.mxu2 %v1393_v16  ;;  %v1257_v14 = vor.u32 %v1451_v11, %v1256_v10  ;;  %v1261_v15 = vor.u32 %v1450_v12, %v1258_v13  ;;  %v1296_v11 = vld [vmem:[#allocation3 + $0xf0] sm:$0xf]  ;;  %v1461_v12 = vld [vmem:[#allocation3 + $0xf4] sm:$0xf0]  ;;  %v1460_v13 = vld [vmem:[#allocation3 + $0xf4] sm:$0xf] }
  0x2f   :  { %461 = vmatmul.bf16.vlgmr.msra.gmra.mxu0 %v1177_v20  ;;  %v1442_v20 = vld [vmem:[#allocation3 + $0x64] sm:$0xf] }
  0x30   :  { %550 = vmatmul.bf16.vlgmr.msra.gmra.mxu1 %v1181_v21  ;;  %v1226_v21 = vld [vmem:[#allocation3 + $0x68] sm:$0xf0]  ;;  %941 = vmatpush.bf16.msra.mxu3 %v1397_v18 }
  0x31   :  { %v1229_v23 = vor.u32 %v1442_v20, %v1226_v21 }
  0x3f   :  { %466 = vmatmul.bf16.gmra.mxu0 %v1185_v26  ;;  %v1482_v26 = vld [vmem:[#allocation8 + $0x24] sm:$0xf] }
  0x40   :  { %555 = vmatmul.bf16.gmra.mxu1 %v1189_v27  ;;  %v1385_v27 = vor.u32 %v1483_v25, %v1384_v24  ;;  %v1389_v29 = vor.u32 %v1482_v26, %v1386_v28  ;;  %v1453_v24 = vld [vmem:[#allocation3 + $0xb4] sm:$0xf0]  ;;  %v1452_v25 = vld [vmem:[#allocation3 + $0xb4] sm:$0xf]  ;;  %v1266_v26 = vld [vmem:[#allocation3 + $0xb8] sm:$0xf0] }
  0x41   :  { %v1269_v28 = vor.u32 %v1452_v25, %v1266_v26 }
  0x42   :  { %853 = vmatpush.bf16.msra.mxu2 %v1385_v27  ;;  %942 = vmatpush.bf16.msra.mxu3 %v1389_v29 }
  0x4f   :  { %471 = vmatmul.bf16.gmra.mxu0 %v1193_v32  ;;  %v1480_v32 = vld [vmem:[#allocation8 + $0x14] sm:$0xf] }
  0x50   :  { %560 = vmatmul.bf16.gmra.mxu1 %v1197_v33  ;;  %v1377_v33 = vor.u32 %v1481_v31, %v1376_v30  ;;  %v1381_v35 = vor.u32 %v1480_v32, %v1378_v34 }
  0x52   :  { %854 = vmatpush.bf16.msra.mxu2 %v1377_v33  ;;  %943 = vmatpush.bf16.msra.mxu3 %v1381_v35 }
  0x5f   :  { %476 = vmatmul.bf16.gmra.mxu0 %v1201_v38  ;;  %v1478_v38 = vld [vmem:[#allocation8 + $0x4] sm:$0xf] }
  0x60   :  { %565 = vmatmul.bf16.gmra.mxu1 %v1205_v39  ;;  %v1369_v39 = vor.u32 %v1479_v37, %v1368_v36  ;;  %v1373_v41 = vor.u32 %v1478_v38, %v1370_v40  ;;  %v1272_v36 = vld [vmem:[#allocation3 + $0xc0] sm:$0xf]  ;;  %v1455_v37 = vld [vmem:[#allocation3 + $0xc4] sm:$0xf0]  ;;  %v1454_v38 = vld [vmem:[#allocation3 + $0xc4] sm:$0xf] }
  0x61   :  { %v1273_v40 = vor.u32 %v1455_v37, %v1272_v36 }
  0x62   :  { %855 = vmatpush.bf16.msra.mxu2 %v1369_v39  ;;  %944 = vmatpush.bf16.msra.mxu3 %v1373_v41  ;;  %v1274_v39 = vld [vmem:[#allocation3 + $0xc8] sm:$0xf0] }
  0x63   :  { %v1277_v41 = vor.u32 %v1454_v38, %v1274_v39 }
  0x6f   :  { %481 = vmatmul.bf16.gmra.mxu0 %v1209_v44  ;;  %v1444_v44 = vld [vmem:[#allocation3 + $0x74] sm:$0xf] }
  0x70   :  { %570 = vmatmul.bf16.gmra.mxu1 %v1213_v45  ;;  %v1234_v45 = vld [vmem:[#allocation3 + $0x78] sm:$0xf0] }
  0x71   :  { %v1237_v47 = vor.u32 %v1444_v44, %v1234_v45 }
  0x7f   :  { %486 = vmatmul.bf16.gmra.mxu0 %v1217_v62  ;;  %v1449_v62 = vld [vmem:[#allocation3 + $0x94] sm:$0xf0] }
  0x80   :  { %575 = vmatmul.bf16.gmra.mxu1 %v1221_v63  ;;  %v1448_v63 = vld [vmem:[#allocation3 + $0x94] sm:$0xf]  ;;  %v1249_v1 = vor.u32 %v1449_v62, %v1248_v61  ;;  %v1288_v62 = vld [vmem:[#allocation3 + $0xe0] sm:$0xf] }
  0x81   :  { %v1253_v2 = vor.u32 %v1448_v63, %v1250_v0  ;;  %v1459_v63 = vld [vmem:[#allocation3 + $0xe4] sm:$0xf0]  ;;  %v1458_v0 = vld [vmem:[#allocation3 + $0xe4] sm:$0xf] }
  0x8f   :  { %491 = vmatmul.bf16.gmra.mxu0 %v1225_v22 }
  0x90   :  { %580 = vmatmul.bf16.gmra.mxu1 %v1229_v23  ;;  %v1264_v23 = vld [vmem:[#allocation3 + $0xb0] sm:$0xf] }
  0x91   :  { %v1265_v27 = vor.u32 %v1453_v24, %v1264_v23 }
  0x9f   :  { %496 = vmatmul.bf16.gmra.mxu0 %v1233_v46 }
  0xa0   :  { %585 = vmatmul.bf16.gmra.mxu1 %v1237_v47 }
  0xac   :  { %v462_v54 = vpop.f32.mrf.mxu0 }
  0xad   :  { %v551_v55 = vpop.f32.mrf.mxu1 }
  0xae   :  { %v552_v58 = vadd.f32 %v551_v55, %v462_v54 }
  0xaf   :  { %501 = vmatmul.bf16.gmra.mxu0 %v1241_v52  ;;  %v1282_v52 = vld [vmem:[#allocation3 + $0xd8] sm:$0xf0] }
  0xb0   :  { %590 = vmatmul.bf16.gmra.mxu1 %v1245_v53  ;;  %v1281_v53 = vor.u32 %v1457_v50, %v1280_v49  ;;  %v1285_v54 = vor.u32 %v1456_v51, %v1282_v52 }
  0xb4   :  { %v464_v56 = vpop.f32.mrf.mxu0 }
  0xb5   :  { %v553_v57 = vpop.f32.mrf.mxu1 }
  0xb6   :  { %v554_v59 = vadd.f32 %v553_v57, %v464_v56 }
  0xb8   :  { %v730_v60 = vpack.c.bf16 %v554_v59, %v552_v58 }
  0xba   :  { %856 = vmatmul.bf16.vlgmr.msra.gmra.mxu2 %v730_v60  ;;  %945 = vmatmul.bf16.vlgmr.msra.gmra.mxu3 %v730_v60 }
  0xbc   :  { %v467_v3 = vpop.f32.mrf.mxu0 }
  0xbd   :  { %v556_v4 = vpop.f32.mrf.mxu1 }
  0xbe   :  { %v557_v7 = vadd.f32 %v556_v4, %v467_v3 }
  0xbf   :  { %506 = vmatmul.bf16.gmra.mxu0 %v1249_v1  ;;  %v1290_v1 = vld [vmem:[#allocation3 + $0xe8] sm:$0xf0] }
  0xc0   :  { %595 = vmatmul.bf16.gmra.mxu1 %v1253_v2  ;;  %v1289_v2 = vor.u32 %v1459_v63, %v1288_v62  ;;  %v1293_v3 = vor.u32 %v1458_v0, %v1290_v1 }
  0xc4   :  { %v469_v5 = vpop.f32.mrf.mxu0 }
  0xc5   :  { %v558_v6 = vpop.f32.mrf.mxu1 }
  0xc6   :  { %v559_v8 = vadd.f32 %v558_v6, %v469_v5 }
  0xc8   :  { %v731_v9 = vpack.c.bf16 %v559_v8, %v557_v7 }
  0xca   :  { %861 = vmatmul.bf16.gmra.mxu2 %v731_v9  ;;  %950 = vmatmul.bf16.gmra.mxu3 %v731_v9 }
  0xcc   :  { %v472_v16 = vpop.f32.mrf.mxu0 }
  0xcd   :  { %v561_v17 = vpop.f32.mrf.mxu1 }
  0xce   :  { %v562_v20 = vadd.f32 %v561_v17, %v472_v16 }
  0xcf   :  { %511 = vmatmul.bf16.gmra.mxu0 %v1257_v14  ;;  %v1298_v14 = vld [vmem:[#allocation3 + $0xf8] sm:$0xf0] }
  0xd0   :  { %600 = vmatmul.bf16.gmra.mxu1 %v1261_v15  ;;  %v1297_v15 = vor.u32 %v1461_v12, %v1296_v11  ;;  %v1301_v16 = vor.u32 %v1460_v13, %v1298_v14 }
  0xd4   :  { %v474_v18 = vpop.f32.mrf.mxu0 }
  0xd5   :  { %v563_v19 = vpop.f32.mrf.mxu1 }
  0xd6   :  { %v564_v21 = vadd.f32 %v563_v19, %v474_v18 }
  0xd8   :  { %v732_v22 = vpack.c.bf16 %v564_v21, %v562_v20 }
  0xda   :  { %866 = vmatmul.bf16.gmra.mxu2 %v732_v22  ;;  %955 = vmatmul.bf16.gmra.mxu3 %v732_v22 }
  0xdc   :  { %v477_v29 = vpop.f32.mrf.mxu0 }
  0xdd   :  { %v566_v30 = vpop.f32.mrf.mxu1 }
  0xde   :  { %v567_v33 = vadd.f32 %v566_v30, %v477_v29 }
  0xdf   :  { %516 = vmatmul.bf16.gmra.mxu0 %v1265_v27 }
  0xe0   :  { %605 = vmatmul.bf16.gmra.mxu1 %v1269_v28 }
  0xe4   :  { %v479_v31 = vpop.f32.mrf.mxu0 }
  0xe5   :  { %v568_v32 = vpop.f32.mrf.mxu1 }
  0xe6   :  { %v569_v34 = vadd.f32 %v568_v32, %v479_v31  ;;  %v762_v31 = vld [vmem:[%s1732_s3] sm:$0x3]  ;;  %s1611_s3 = smov [#allocation9]  }
  0xe7   :  { %v1655_v32 = vperm.slane %v762_v31, 0  ;;  %s1158_s7 = sshll.u32 %s1611_s3, 4  ;;  %s1159_s7 = int_to_ptr.vmem [resolvable:$true] %s1158_s7 }
  0xe8   :  { %v733_v35 = vpack.c.bf16 %v569_v34, %v567_v33  ;;  %v1657_v33 = vperm.slane %v762_v31, 1 }
  0xea   :  { %871 = vmatmul.bf16.gmra.mxu2 %v733_v35  ;;  %960 = vmatmul.bf16.gmra.mxu3 %v733_v35 }
  0xec   :  { %v482_v42 = vpop.f32.mrf.mxu0 }
  0xed   :  { %v571_v43 = vpop.f32.mrf.mxu1 }
  0xee   :  { %v572_v46 = vadd.f32 %v571_v43, %v482_v42 }
  0xef   :  { %521 = vmatmul.bf16.gmra.mxu0 %v1273_v40 }
  0xf0   :  { %610 = vmatmul.bf16.gmra.mxu1 %v1277_v41 }
  0xf4   :  { %v484_v44 = vpop.f32.mrf.mxu0 }
  0xf5   :  { %v573_v45 = vpop.f32.mrf.mxu1 }
  0xf6   :  { %v574_v47 = vadd.f32 %v573_v45, %v484_v44 }
  0xf8   :  { %v734_v48 = vpack.c.bf16 %v574_v47, %v572_v46 }
  0xfa   :  { %876 = vmatmul.bf16.gmra.mxu2 %v734_v48  ;;  %965 = vmatmul.bf16.gmra.mxu3 %v734_v48 }
  0xfc   :  { %v487_v55 = vpop.f32.mrf.mxu0 }
  0xfd   :  { %v576_v56 = vpop.f32.mrf.mxu1 }
  0xfe   :  { %v577_v59 = vadd.f32 %v576_v56, %v487_v55 }
  0xff   :  { %526 = vmatmul.bf16.gmra.mxu0 %v1281_v53 }
 0x100   :  { %615 = vmatmul.bf16.gmra.mxu1 %v1285_v54 }
 0x104   :  { %v489_v57 = vpop.f32.mrf.mxu0 }
 0x105   :  { %v578_v58 = vpop.f32.mrf.mxu1 }
 0x106   :  { %v579_v60 = vadd.f32 %v578_v58, %v489_v57 }
 0x108   :  { %v735_v61 = vpack.c.bf16 %v579_v60, %v577_v59 }
 0x10a   :  { %881 = vmatmul.bf16.gmra.mxu2 %v735_v61  ;;  %970 = vmatmul.bf16.gmra.mxu3 %v735_v61 }
 0x10c   :  { %v492_v4 = vpop.f32.mrf.mxu0 }
 0x10d   :  { %v581_v5 = vpop.f32.mrf.mxu1 }
 0x10e   :  { %v582_v8 = vadd.f32 %v581_v5, %v492_v4 }
 0x10f   :  { %531 = vmatmul.bf16.gmra.mxu0 %v1289_v2 }
 0x110   :  { %620 = vmatmul.bf16.gmra.mxu1 %v1293_v3 }
 0x114   :  { %v494_v6 = vpop.f32.mrf.mxu0 }
 0x115   :  { %v583_v7 = vpop.f32.mrf.mxu1 }
 0x116   :  { %v584_v9 = vadd.f32 %v583_v7, %v494_v6 }
 0x118   :  { %v736_v10 = vpack.c.bf16 %v584_v9, %v582_v8 }
 0x11a   :  { %886 = vmatmul.bf16.gmra.mxu2 %v736_v10  ;;  %975 = vmatmul.bf16.gmra.mxu3 %v736_v10 }
 0x11c   :  { %v497_v17 = vpop.f32.mrf.mxu0 }
 0x11d   :  { %v586_v18 = vpop.f32.mrf.mxu1 }
 0x11e   :  { %v587_v21 = vadd.f32 %v586_v18, %v497_v17 }
 0x11f   :  { %536 = vmatmul.bf16.gmra.mxu0 %v1297_v15 }
 0x120   :  { %625 = vmatmul.bf16.gmra.mxu1 %v1301_v16 }
 0x124   :  { %v499_v19 = vpop.f32.mrf.mxu0 }
 0x125   :  { %v588_v20 = vpop.f32.mrf.mxu1 }
 0x126   :  { %v589_v22 = vadd.f32 %v588_v20, %v499_v19 }
 0x128   :  { %v737_v23 = vpack.c.bf16 %v589_v22, %v587_v21 }
 0x12a   :  { %891 = vmatmul.bf16.gmra.mxu2 %v737_v23  ;;  %980 = vmatmul.bf16.gmra.mxu3 %v737_v23 }
 0x12c   :  { %v502_v24 = vpop.f32.mrf.mxu0 }
 0x12d   :  { %v591_v25 = vpop.f32.mrf.mxu1 }
 0x12e   :  { %v592_v28 = vadd.f32 %v591_v25, %v502_v24 }
 0x134   :  { %v504_v26 = vpop.f32.mrf.mxu0 }
 0x135   :  { %v593_v27 = vpop.f32.mrf.mxu1 }
 0x136   :  { %v594_v29 = vadd.f32 %v593_v27, %v504_v26 }
 0x138   :  { %v738_v30 = vpack.c.bf16 %v594_v29, %v592_v28 }
 0x13a   :  { %896 = vmatmul.bf16.gmra.mxu2 %v738_v30  ;;  %985 = vmatmul.bf16.gmra.mxu3 %v738_v30 }
 0x13c   :  { %v507_v34 = vpop.f32.mrf.mxu0 }
 0x13d   :  { %v596_v35 = vpop.f32.mrf.mxu1  ;;  %v857_v36 = vpop.f32.mrf.mxu2 }
 0x13e   :  { %v946_v37 = vpop.f32.mrf.mxu3  ;;  %v858_v38 = vadd.f32 %v857_v36, %v1655_v32  ;;  %v597_v45 = vadd.f32 %v596_v35, %v507_v34 }
 0x13f   :  { %v947_v39 = vadd.f32 %v946_v37, %v1657_v33 }
 0x140   :  { %v1026_v40 = vmax.f32 %v858_v38, 0.0 }
 0x141   :  { %v1027_v41 = vmax.f32 %v947_v39, 0.0 }
 0x143   :  { %v1090_v42 = vpack.c.bf16 %v1027_v41, %v1026_v40 }
 0x144   :  { %v509_v43 = vpop.f32.mrf.mxu0 }
 0x145   :  { %1122 = vst [vmem:[#allocation9] sm:$0xff] %v1090_v42  ;;  %v598_v44 = vpop.f32.mrf.mxu1  ;;  %v859_v47 = vpop.f32.mrf.mxu2 }
 0x146   :  { %v599_v46 = vadd.f32 %v598_v44, %v509_v43  ;;  %v948_v48 = vpop.f32.mrf.mxu3  ;;  %v860_v49 = vadd.f32 %v859_v47, %v1655_v32 }
 0x147   :  { %v949_v50 = vadd.f32 %v948_v48, %v1657_v33 }
 0x148   :  { %v739_v51 = vpack.c.bf16 %v599_v46, %v597_v45  ;;  %v1028_v52 = vmax.f32 %v860_v49, 0.0 }
 0x149   :  { %v1029_v53 = vmax.f32 %v949_v50, 0.0 }
 0x14a   :  { %901 = vmatmul.bf16.gmra.mxu2 %v739_v51  ;;  %990 = vmatmul.bf16.gmra.mxu3 %v739_v51 }
 0x14b   :  { %v1091_v54 = vpack.c.bf16 %v1029_v53, %v1028_v52 }
 0x14c   :  { %v512_v55 = vpop.f32.mrf.mxu0 }
 0x14d   :  { %1123 = vst [vmem:[#allocation9 + $0x8] sm:$0xff] %v1091_v54  ;;  %v601_v56 = vpop.f32.mrf.mxu1  ;;  %v862_v57 = vpop.f32.mrf.mxu2 }
 0x14e   :  { %v951_v58 = vpop.f32.mrf.mxu3  ;;  %v863_v59 = vadd.f32 %v862_v57, %v1655_v32  ;;  %v602_v2 = vadd.f32 %v601_v56, %v512_v55 }
 0x14f   :  { %v952_v60 = vadd.f32 %v951_v58, %v1657_v33 }
 0x150   :  { %v1030_v61 = vmax.f32 %v863_v59, 0.0 }
 0x151   :  { %v1031_v62 = vmax.f32 %v952_v60, 0.0 }
 0x153   :  { %v1092_v63 = vpack.c.bf16 %v1031_v62, %v1030_v61 }
 0x154   :  { %v514_v0 = vpop.f32.mrf.mxu0 }
 0x155   :  { %1124 = vst [vmem:[#allocation9 + $0x10] sm:$0xff] %v1092_v63  ;;  %v603_v1 = vpop.f32.mrf.mxu1  ;;  %v864_v4 = vpop.f32.mrf.mxu2 }
 0x156   :  { %v604_v3 = vadd.f32 %v603_v1, %v514_v0  ;;  %v953_v5 = vpop.f32.mrf.mxu3  ;;  %v865_v6 = vadd.f32 %v864_v4, %v1655_v32 }
 0x157   :  { %v954_v7 = vadd.f32 %v953_v5, %v1657_v33 }
 0x158   :  { %v740_v8 = vpack.c.bf16 %v604_v3, %v602_v2  ;;  %v1032_v9 = vmax.f32 %v865_v6, 0.0 }
 0x159   :  { %v1033_v10 = vmax.f32 %v954_v7, 0.0 }
 0x15a   :  { %906 = vmatmul.bf16.gmra.mxu2 %v740_v8  ;;  %995 = vmatmul.bf16.gmra.mxu3 %v740_v8 }
 0x15b   :  { %v1093_v11 = vpack.c.bf16 %v1033_v10, %v1032_v9 }
 0x15c   :  { %v517_v12 = vpop.f32.mrf.mxu0 }
 0x15d   :  { %1125 = vst [vmem:[#allocation9 + $0x18] sm:$0xff] %v1093_v11  ;;  %v606_v13 = vpop.f32.mrf.mxu1  ;;  %v867_v14 = vpop.f32.mrf.mxu2 }
 0x15e   :  { %v956_v15 = vpop.f32.mrf.mxu3  ;;  %v868_v16 = vadd.f32 %v867_v14, %v1655_v32  ;;  %v607_v23 = vadd.f32 %v606_v13, %v517_v12 }
 0x15f   :  { %v957_v17 = vadd.f32 %v956_v15, %v1657_v33 }
 0x160   :  { %v1034_v18 = vmax.f32 %v868_v16, 0.0 }
 0x161   :  { %v1035_v19 = vmax.f32 %v957_v17, 0.0 }
 0x163   :  { %v1094_v20 = vpack.c.bf16 %v1035_v19, %v1034_v18 }
 0x164   :  { %v519_v21 = vpop.f32.mrf.mxu0 }
 0x165   :  { %1126 = vst [vmem:[#allocation9 + $0x20] sm:$0xff] %v1094_v20  ;;  %v608_v22 = vpop.f32.mrf.mxu1  ;;  %v869_v25 = vpop.f32.mrf.mxu2 }
 0x166   :  { %v609_v24 = vadd.f32 %v608_v22, %v519_v21  ;;  %v958_v26 = vpop.f32.mrf.mxu3  ;;  %v870_v27 = vadd.f32 %v869_v25, %v1655_v32 }
 0x167   :  { %v959_v28 = vadd.f32 %v958_v26, %v1657_v33 }
 0x168   :  { %v741_v29 = vpack.c.bf16 %v609_v24, %v607_v23  ;;  %v1036_v30 = vmax.f32 %v870_v27, 0.0 }
 0x169   :  { %v1037_v31 = vmax.f32 %v959_v28, 0.0 }
 0x16a   :  { %911 = vmatmul.bf16.gmra.mxu2 %v741_v29  ;;  %1000 = vmatmul.bf16.gmra.mxu3 %v741_v29 }
 0x16b   :  { %v1095_v34 = vpack.c.bf16 %v1037_v31, %v1036_v30 }
 0x16c   :  { %v522_v35 = vpop.f32.mrf.mxu0 }
 0x16d   :  { %1127 = vst [vmem:[#allocation9 + $0x28] sm:$0xff] %v1095_v34  ;;  %v611_v36 = vpop.f32.mrf.mxu1  ;;  %v872_v37 = vpop.f32.mrf.mxu2 }
 0x16e   :  { %v961_v38 = vpop.f32.mrf.mxu3  ;;  %v873_v39 = vadd.f32 %v872_v37, %v1655_v32  ;;  %v612_v46 = vadd.f32 %v611_v36, %v522_v35 }
 0x16f   :  { %v962_v40 = vadd.f32 %v961_v38, %v1657_v33 }
 0x170   :  { %v1038_v41 = vmax.f32 %v873_v39, 0.0 }
 0x171   :  { %v1039_v42 = vmax.f32 %v962_v40, 0.0 }
 0x173   :  { %v1096_v43 = vpack.c.bf16 %v1039_v42, %v1038_v41 }
 0x174   :  { %v524_v44 = vpop.f32.mrf.mxu0 }
 0x175   :  { %1128 = vst [vmem:[#allocation9 + $0x30] sm:$0xff] %v1096_v43  ;;  %v613_v45 = vpop.f32.mrf.mxu1  ;;  %v874_v48 = vpop.f32.mrf.mxu2 }
 0x176   :  { %v614_v47 = vadd.f32 %v613_v45, %v524_v44  ;;  %v963_v49 = vpop.f32.mrf.mxu3  ;;  %v875_v50 = vadd.f32 %v874_v48, %v1655_v32 }
 0x177   :  { %v964_v51 = vadd.f32 %v963_v49, %v1657_v33 }
 0x178   :  { %v742_v52 = vpack.c.bf16 %v614_v47, %v612_v46  ;;  %v1040_v53 = vmax.f32 %v875_v50, 0.0 }
 0x179   :  { %v1041_v54 = vmax.f32 %v964_v51, 0.0 }
 0x17a   :  { %916 = vmatmul.bf16.gmra.mxu2 %v742_v52  ;;  %1005 = vmatmul.bf16.gmra.mxu3 %v742_v52 }
 0x17b   :  { %v1097_v55 = vpack.c.bf16 %v1041_v54, %v1040_v53 }
 0x17c   :  { %v527_v56 = vpop.f32.mrf.mxu0 }
 0x17d   :  { %1129 = vst [vmem:[#allocation9 + $0x38] sm:$0xff] %v1097_v55  ;;  %v616_v57 = vpop.f32.mrf.mxu1  ;;  %v877_v58 = vpop.f32.mrf.mxu2 }
 0x17e   :  { %v966_v59 = vpop.f32.mrf.mxu3  ;;  %v878_v60 = vadd.f32 %v877_v58, %v1655_v32  ;;  %v617_v3 = vadd.f32 %v616_v57, %v527_v56 }
 0x17f   :  { %v967_v61 = vadd.f32 %v966_v59, %v1657_v33 }
 0x180   :  { %v1042_v62 = vmax.f32 %v878_v60, 0.0 }
 0x181   :  { %v1043_v63 = vmax.f32 %v967_v61, 0.0 }
 0x183   :  { %v1098_v0 = vpack.c.bf16 %v1043_v63, %v1042_v62 }
 0x184   :  { %v529_v1 = vpop.f32.mrf.mxu0 }
 0x185   :  { %1130 = vst [vmem:[#allocation9 + $0x40] sm:$0xff] %v1098_v0  ;;  %v618_v2 = vpop.f32.mrf.mxu1  ;;  %v879_v5 = vpop.f32.mrf.mxu2 }
 0x186   :  { %v619_v4 = vadd.f32 %v618_v2, %v529_v1  ;;  %v968_v6 = vpop.f32.mrf.mxu3  ;;  %v880_v7 = vadd.f32 %v879_v5, %v1655_v32 }
 0x187   :  { %v969_v8 = vadd.f32 %v968_v6, %v1657_v33 }
 0x188   :  { %v743_v9 = vpack.c.bf16 %v619_v4, %v617_v3  ;;  %v1044_v10 = vmax.f32 %v880_v7, 0.0 }
 0x189   :  { %v1045_v11 = vmax.f32 %v969_v8, 0.0 }
 0x18a   :  { %921 = vmatmul.bf16.gmra.mxu2 %v743_v9  ;;  %1010 = vmatmul.bf16.gmra.mxu3 %v743_v9 }
 0x18b   :  { %v1099_v12 = vpack.c.bf16 %v1045_v11, %v1044_v10 }
 0x18c   :  { %v532_v13 = vpop.f32.mrf.mxu0 }
 0x18d   :  { %1131 = vst [vmem:[#allocation9 + $0x48] sm:$0xff] %v1099_v12  ;;  %v621_v14 = vpop.f32.mrf.mxu1  ;;  %v882_v15 = vpop.f32.mrf.mxu2 }
 0x18e   :  { %v971_v16 = vpop.f32.mrf.mxu3  ;;  %v883_v17 = vadd.f32 %v882_v15, %v1655_v32  ;;  %v622_v24 = vadd.f32 %v621_v14, %v532_v13 }
 0x18f   :  { %v972_v18 = vadd.f32 %v971_v16, %v1657_v33 }
 0x190   :  { %v1046_v19 = vmax.f32 %v883_v17, 0.0 }
 0x191   :  { %v1047_v20 = vmax.f32 %v972_v18, 0.0 }
 0x193   :  { %v1100_v21 = vpack.c.bf16 %v1047_v20, %v1046_v19 }
 0x194   :  { %v534_v22 = vpop.f32.mrf.mxu0 }
 0x195   :  { %1132 = vst [vmem:[#allocation9 + $0x50] sm:$0xff] %v1100_v21  ;;  %v623_v23 = vpop.f32.mrf.mxu1  ;;  %v884_v26 = vpop.f32.mrf.mxu2 }
 0x196   :  { %v624_v25 = vadd.f32 %v623_v23, %v534_v22  ;;  %v973_v27 = vpop.f32.mrf.mxu3  ;;  %v885_v28 = vadd.f32 %v884_v26, %v1655_v32 }
 0x197   :  { %v974_v29 = vadd.f32 %v973_v27, %v1657_v33 }
 0x198   :  { %v744_v30 = vpack.c.bf16 %v624_v25, %v622_v24  ;;  %v1048_v31 = vmax.f32 %v885_v28, 0.0 }
 0x199   :  { %v1049_v34 = vmax.f32 %v974_v29, 0.0 }
 0x19a   :  { %926 = vmatmul.bf16.gmra.mxu2 %v744_v30  ;;  %1015 = vmatmul.bf16.gmra.mxu3 %v744_v30 }
 0x19b   :  { %v1101_v35 = vpack.c.bf16 %v1049_v34, %v1048_v31 }
 0x19c   :  { %v537_v36 = vpop.f32.mrf.mxu0 }
 0x19d   :  { %1133 = vst [vmem:[#allocation9 + $0x58] sm:$0xff] %v1101_v35  ;;  %v626_v37 = vpop.f32.mrf.mxu1  ;;  %v887_v38 = vpop.f32.mrf.mxu2 }
 0x19e   :  { %v976_v39 = vpop.f32.mrf.mxu3  ;;  %v888_v40 = vadd.f32 %v887_v38, %v1655_v32  ;;  %v627_v47 = vadd.f32 %v626_v37, %v537_v36 }
 0x19f   :  { %v977_v41 = vadd.f32 %v976_v39, %v1657_v33 }
 0x1a0   :  { %v1050_v42 = vmax.f32 %v888_v40, 0.0 }
 0x1a1   :  { %v1051_v43 = vmax.f32 %v977_v41, 0.0 }
 0x1a3   :  { %v1102_v44 = vpack.c.bf16 %v1051_v43, %v1050_v42 }
 0x1a4   :  { %v539_v45 = vpop.f32.mrf.mxu0 }
 0x1a5   :  { %1134 = vst [vmem:[#allocation9 + $0x60] sm:$0xff] %v1102_v44  ;;  %v628_v46 = vpop.f32.mrf.mxu1  ;;  %v889_v49 = vpop.f32.mrf.mxu2 }
 0x1a6   :  { %v629_v48 = vadd.f32 %v628_v46, %v539_v45  ;;  %v978_v50 = vpop.f32.mrf.mxu3  ;;  %v890_v51 = vadd.f32 %v889_v49, %v1655_v32 }
 0x1a7   :  { %v979_v52 = vadd.f32 %v978_v50, %v1657_v33 }
 0x1a8   :  { %v745_v53 = vpack.c.bf16 %v629_v48, %v627_v47  ;;  %v1052_v54 = vmax.f32 %v890_v51, 0.0 }
 0x1a9   :  { %v1053_v55 = vmax.f32 %v979_v52, 0.0 }
 0x1aa   :  { %931 = vmatmul.bf16.gmra.mxu2 %v745_v53  ;;  %1020 = vmatmul.bf16.gmra.mxu3 %v745_v53 }
 0x1ab   :  { %v1103_v56 = vpack.c.bf16 %v1053_v55, %v1052_v54 }
 0x1ad   :  { %1135 = vst [vmem:[#allocation9 + $0x68] sm:$0xff] %v1103_v56  ;;  %v892_v57 = vpop.f32.mrf.mxu2 }
 0x1ae   :  { %v981_v58 = vpop.f32.mrf.mxu3  ;;  %v893_v59 = vadd.f32 %v892_v57, %v1655_v32 }
 0x1af   :  { %v982_v60 = vadd.f32 %v981_v58, %v1657_v33 }
 0x1b0   :  { %v1054_v61 = vmax.f32 %v893_v59, 0.0 }
 0x1b1   :  { %v1055_v62 = vmax.f32 %v982_v60, 0.0 }
 0x1b3   :  { %v1104_v63 = vpack.c.bf16 %v1055_v62, %v1054_v61 }
 0x1b5   :  { %1136 = vst [vmem:[#allocation9 + $0x70] sm:$0xff] %v1104_v63  ;;  %v894_v0 = vpop.f32.mrf.mxu2 }
 0x1b6   :  { %v983_v1 = vpop.f32.mrf.mxu3  ;;  %v895_v2 = vadd.f32 %v894_v0, %v1655_v32 }
 0x1b7   :  { %v984_v3 = vadd.f32 %v983_v1, %v1657_v33 }
 0x1b8   :  { %v1056_v4 = vmax.f32 %v895_v2, 0.0 }
 0x1b9   :  { %v1057_v5 = vmax.f32 %v984_v3, 0.0 }
 0x1bb   :  { %v1105_v6 = vpack.c.bf16 %v1057_v5, %v1056_v4 }
 0x1bd   :  { %1137 = vst [vmem:[#allocation9 + $0x78] sm:$0xff] %v1105_v6  ;;  %v897_v7 = vpop.f32.mrf.mxu2 }
 0x1be   :  { %v986_v8 = vpop.f32.mrf.mxu3  ;;  %v898_v9 = vadd.f32 %v897_v7, %v1655_v32 }
 0x1bf   :  { %v987_v10 = vadd.f32 %v986_v8, %v1657_v33 }
 0x1c0   :  { %v1058_v11 = vmax.f32 %v898_v9, 0.0 }
 0x1c1   :  { %v1059_v12 = vmax.f32 %v987_v10, 0.0 }
 0x1c3   :  { %v1106_v13 = vpack.c.bf16 %v1059_v12, %v1058_v11 }
 0x1c5   :  { %1138 = vst [vmem:[#allocation9 + $0x80] sm:$0xff] %v1106_v13  ;;  %v899_v14 = vpop.f32.mrf.mxu2 }
 0x1c6   :  { %v988_v15 = vpop.f32.mrf.mxu3  ;;  %v900_v16 = vadd.f32 %v899_v14, %v1655_v32 }
 0x1c7   :  { %v989_v17 = vadd.f32 %v988_v15, %v1657_v33 }
 0x1c8   :  { %v1060_v18 = vmax.f32 %v900_v16, 0.0 }
 0x1c9   :  { %v1061_v19 = vmax.f32 %v989_v17, 0.0 }
 0x1cb   :  { %v1107_v20 = vpack.c.bf16 %v1061_v19, %v1060_v18 }
 0x1cd   :  { %1139 = vst [vmem:[#allocation9 + $0x88] sm:$0xff] %v1107_v20  ;;  %v902_v21 = vpop.f32.mrf.mxu2 }
 0x1ce   :  { %v991_v22 = vpop.f32.mrf.mxu3  ;;  %v903_v23 = vadd.f32 %v902_v21, %v1655_v32 }
 0x1cf   :  { %v992_v24 = vadd.f32 %v991_v22, %v1657_v33 }
 0x1d0   :  { %v1062_v25 = vmax.f32 %v903_v23, 0.0 }
 0x1d1   :  { %v1063_v26 = vmax.f32 %v992_v24, 0.0 }
 0x1d3   :  { %v1108_v27 = vpack.c.bf16 %v1063_v26, %v1062_v25 }
 0x1d5   :  { %1140 = vst [vmem:[#allocation9 + $0x90] sm:$0xff] %v1108_v27  ;;  %v904_v28 = vpop.f32.mrf.mxu2 }
 0x1d6   :  { %v993_v29 = vpop.f32.mrf.mxu3  ;;  %v905_v30 = vadd.f32 %v904_v28, %v1655_v32 }
 0x1d7   :  { %v994_v31 = vadd.f32 %v993_v29, %v1657_v33 }
 0x1d8   :  { %v1064_v34 = vmax.f32 %v905_v30, 0.0 }
 0x1d9   :  { %v1065_v35 = vmax.f32 %v994_v31, 0.0 }
 0x1db   :  { %v1109_v36 = vpack.c.bf16 %v1065_v35, %v1064_v34 }
 0x1dd   :  { %1141 = vst [vmem:[#allocation9 + $0x98] sm:$0xff] %v1109_v36  ;;  %v907_v37 = vpop.f32.mrf.mxu2 }
 0x1de   :  { %v996_v38 = vpop.f32.mrf.mxu3  ;;  %v908_v39 = vadd.f32 %v907_v37, %v1655_v32 }
 0x1df   :  { %v997_v40 = vadd.f32 %v996_v38, %v1657_v33 }
 0x1e0   :  { %v1066_v41 = vmax.f32 %v908_v39, 0.0 }
 0x1e1   :  { %v1067_v42 = vmax.f32 %v997_v40, 0.0 }
 0x1e3   :  { %v1110_v43 = vpack.c.bf16 %v1067_v42, %v1066_v41 }
 0x1e5   :  { %1142 = vst [vmem:[#allocation9 + $0xa0] sm:$0xff] %v1110_v43  ;;  %v909_v44 = vpop.f32.mrf.mxu2 }
 0x1e6   :  { %v998_v45 = vpop.f32.mrf.mxu3  ;;  %v910_v46 = vadd.f32 %v909_v44, %v1655_v32 }
 0x1e7   :  { %v999_v47 = vadd.f32 %v998_v45, %v1657_v33 }
 0x1e8   :  { %v1068_v48 = vmax.f32 %v910_v46, 0.0 }
 0x1e9   :  { %v1069_v49 = vmax.f32 %v999_v47, 0.0 }
 0x1eb   :  { %v1111_v50 = vpack.c.bf16 %v1069_v49, %v1068_v48 }
 0x1ed   :  { %1143 = vst [vmem:[#allocation9 + $0xa8] sm:$0xff] %v1111_v50  ;;  %v912_v51 = vpop.f32.mrf.mxu2 }
 0x1ee   :  { %v1001_v52 = vpop.f32.mrf.mxu3  ;;  %v913_v53 = vadd.f32 %v912_v51, %v1655_v32 }
 0x1ef   :  { %v1002_v54 = vadd.f32 %v1001_v52, %v1657_v33 }
 0x1f0   :  { %v1070_v55 = vmax.f32 %v913_v53, 0.0 }
 0x1f1   :  { %v1071_v56 = vmax.f32 %v1002_v54, 0.0 }
 0x1f3   :  { %v1112_v57 = vpack.c.bf16 %v1071_v56, %v1070_v55 }
 0x1f5   :  { %1144 = vst [vmem:[#allocation9 + $0xb0] sm:$0xff] %v1112_v57  ;;  %v914_v58 = vpop.f32.mrf.mxu2 }
 0x1f6   :  { %v1003_v59 = vpop.f32.mrf.mxu3  ;;  %v915_v60 = vadd.f32 %v914_v58, %v1655_v32 }
 0x1f7   :  { %v1004_v61 = vadd.f32 %v1003_v59, %v1657_v33 }
 0x1f8   :  { %v1072_v62 = vmax.f32 %v915_v60, 0.0 }
 0x1f9   :  { %v1073_v63 = vmax.f32 %v1004_v61, 0.0 }
 0x1fb   :  { %v1113_v0 = vpack.c.bf16 %v1073_v63, %v1072_v62 }
 0x1fd   :  { %1145 = vst [vmem:[#allocation9 + $0xb8] sm:$0xff] %v1113_v0  ;;  %v917_v1 = vpop.f32.mrf.mxu2 }
 0x1fe   :  { %v1006_v2 = vpop.f32.mrf.mxu3  ;;  %v918_v3 = vadd.f32 %v917_v1, %v1655_v32 }
 0x1ff   :  { %v1007_v4 = vadd.f32 %v1006_v2, %v1657_v33 }
 0x200   :  { %v1074_v5 = vmax.f32 %v918_v3, 0.0 }
 0x201   :  { %v1075_v6 = vmax.f32 %v1007_v4, 0.0 }
 0x203   :  { %v1114_v7 = vpack.c.bf16 %v1075_v6, %v1074_v5 }
 0x205   :  { %1146 = vst [vmem:[#allocation9 + $0xc0] sm:$0xff] %v1114_v7  ;;  %v919_v8 = vpop.f32.mrf.mxu2 }
 0x206   :  { %v1008_v9 = vpop.f32.mrf.mxu3  ;;  %v920_v10 = vadd.f32 %v919_v8, %v1655_v32 }
 0x207   :  { %v1009_v11 = vadd.f32 %v1008_v9, %v1657_v33 }
 0x208   :  { %v1076_v12 = vmax.f32 %v920_v10, 0.0 }
 0x209   :  { %v1077_v13 = vmax.f32 %v1009_v11, 0.0 }
 0x20b   :  { %v1115_v14 = vpack.c.bf16 %v1077_v13, %v1076_v12 }
 0x20d   :  { %1147 = vst [vmem:[#allocation9 + $0xc8] sm:$0xff] %v1115_v14  ;;  %v922_v15 = vpop.f32.mrf.mxu2 }
 0x20e   :  { %v1011_v16 = vpop.f32.mrf.mxu3  ;;  %v923_v17 = vadd.f32 %v922_v15, %v1655_v32 }
 0x20f   :  { %v1012_v18 = vadd.f32 %v1011_v16, %v1657_v33 }
 0x210   :  { %v1078_v19 = vmax.f32 %v923_v17, 0.0 }
 0x211   :  { %v1079_v20 = vmax.f32 %v1012_v18, 0.0 }
 0x213   :  { %v1116_v21 = vpack.c.bf16 %v1079_v20, %v1078_v19 }
 0x215   :  { %1148 = vst [vmem:[#allocation9 + $0xd0] sm:$0xff] %v1116_v21  ;;  %v924_v22 = vpop.f32.mrf.mxu2 }
 0x216   :  { %v1013_v23 = vpop.f32.mrf.mxu3  ;;  %v925_v24 = vadd.f32 %v924_v22, %v1655_v32 }
 0x217   :  { %v1014_v25 = vadd.f32 %v1013_v23, %v1657_v33 }
 0x218   :  { %v1080_v26 = vmax.f32 %v925_v24, 0.0 }
 0x219   :  { %v1081_v27 = vmax.f32 %v1014_v25, 0.0 }
 0x21b   :  { %v1117_v28 = vpack.c.bf16 %v1081_v27, %v1080_v26 }
 0x21d   :  { %1149 = vst [vmem:[#allocation9 + $0xd8] sm:$0xff] %v1117_v28  ;;  %v927_v29 = vpop.f32.mrf.mxu2 }
 0x21e   :  { %v1016_v30 = vpop.f32.mrf.mxu3  ;;  %v928_v31 = vadd.f32 %v927_v29, %v1655_v32 }
 0x21f   :  { %v1017_v34 = vadd.f32 %v1016_v30, %v1657_v33 }
 0x220   :  { %v1082_v35 = vmax.f32 %v928_v31, 0.0 }
 0x221   :  { %v1083_v36 = vmax.f32 %v1017_v34, 0.0 }
 0x223   :  { %v1118_v37 = vpack.c.bf16 %v1083_v36, %v1082_v35 }
 0x225   :  { %1150 = vst [vmem:[#allocation9 + $0xe0] sm:$0xff] %v1118_v37  ;;  %v929_v38 = vpop.f32.mrf.mxu2 }
 0x226   :  { %v1018_v39 = vpop.f32.mrf.mxu3  ;;  %v930_v40 = vadd.f32 %v929_v38, %v1655_v32 }
 0x227   :  { %v1019_v41 = vadd.f32 %v1018_v39, %v1657_v33 }
 0x228   :  { %v1084_v42 = vmax.f32 %v930_v40, 0.0 }
 0x229   :  { %v1085_v43 = vmax.f32 %v1019_v41, 0.0 }
 0x22b   :  { %v1119_v44 = vpack.c.bf16 %v1085_v43, %v1084_v42 }
 0x22d   :  { %1151 = vst [vmem:[#allocation9 + $0xe8] sm:$0xff] %v1119_v44  ;;  %v932_v45 = vpop.f32.mrf.mxu2 }
 0x22e   :  { %v1021_v46 = vpop.f32.mrf.mxu3  ;;  %v933_v47 = vadd.f32 %v932_v45, %v1655_v32 }
 0x22f   :  { %v1022_v48 = vadd.f32 %v1021_v46, %v1657_v33 }
 0x230   :  { %v1086_v49 = vmax.f32 %v933_v47, 0.0 }
 0x231   :  { %v1087_v50 = vmax.f32 %v1022_v48, 0.0 }
 0x233   :  { %v1120_v51 = vpack.c.bf16 %v1087_v50, %v1086_v49 }
 0x235   :  { %1152 = vst [vmem:[#allocation9 + $0xf0] sm:$0xff] %v1120_v51  ;;  %v934_v52 = vpop.f32.mrf.mxu2 }
 0x236   :  { %v1023_v53 = vpop.f32.mrf.mxu3  ;;  %v935_v54 = vadd.f32 %v934_v52, %v1655_v32 }
 0x237   :  { %v1024_v55 = vadd.f32 %v1023_v53, %v1657_v33 }
 0x238   :  { %v1088_v56 = vmax.f32 %v935_v54, 0.0 }
 0x239   :  { %v1089_v57 = vmax.f32 %v1024_v55, 0.0 }
 0x23b   :  { %v1121_v58 = vpack.c.bf16 %v1089_v57, %v1088_v56 }
 0x23d   :  { %1153 = vst [vmem:[#allocation9 + $0xf8] sm:$0xff] %v1121_v58 }
 0x23e   :  { %1166 = dma.vmem_to_hbm [thread:$0]  %s1159_s7, 4096, %s1161_s10, [#allocation5], %s1608_s27, %s1608_s27, %s1609_s28  }
 0x23f   :  { %1602 = dma.done.wait [#allocation5], 4096  }
 0x240   :  { %1603 = vsyncadd [#allocation5], 4294963200 }
 0x241   :  { %1171 = vsyncpa [#allocation4], 1 }
 0x242   :  { %1172 = vsyncpa [#allocation7], 1 }
 0x243   :  { %1173 = vsyncpa [#allocation5], 1 }

</bundles_post_ra>
